<compile_context>
chip_gen: v7x
topology: tpu7x:2x2x1
jax: 0.10.0
libtpu: 0.0.40
codegen_flags: <defaults>
</compile_context>

<pallas_src>
import functools

import jax
import jax.numpy as jnp
from jax import lax
from jax.experimental import pallas as pl
from jax.experimental.pallas import tpu as pltpu


D_MODEL = 64
HEADS = 4
D_K = D_MODEL // HEADS
SCALE = float(D_K) ** 0.5          # matches torch sqrt(d_k)
LN_EPS = 1e-5
_MASK_VALUE = -1e30                # finite large-negative; avoids exp(-inf - (-inf)) NaNs


def _attention_kernel(x_ref, wqkv_ref, bqkv_ref, wout_ref, bout_ref,
                      gamma_ref, beta_ref, o_ref, ctx_ref, *,
                      b_blk, seq_len, causal, matmul_dtype):
    S = seq_len
    R = b_blk * S                   # rows processed this grid step
    Z = b_blk * HEADS               # batched (batch, head) problems

    # ---- Flatten the batch block: projections run on the (R, D) slab ----
    x = x_ref[...].reshape(R, D_MODEL)                        # f32, kept for residual
    x_mm = x.astype(matmul_dtype)

    # ---- QKV projection: one (R,D)@(D,3D) MXU matmul, f32 accumulation ----
    qkv = jnp.dot(x_mm, wqkv_ref[...],
                  preferred_element_type=jnp.float32) + bqkv_ref[0]   # (R, 3D) f32

    inv_scale = 1.0 / SCALE
    q = (qkv[:, :D_MODEL] * inv_scale).astype(matmul_dtype)   # 1/sqrt(d_k) folded into q
    k = qkv[:, D_MODEL:2 * D_MODEL].astype(matmul_dtype)
    v = qkv[:, 2 * D_MODEL:].astype(matmul_dtype)

    # ---- Split heads once: (R, D) -> (HEADS, R, d_k) -> (Z, S, d_k), z = h*b_blk + b.
    # Heads and batch rows become a single leading batch dim so all attention math
    # below is batched (one reshape; the sublane split is tile-aligned for S % 8 == 0).
    def to_heads(t):
        th = jnp.stack([t[:, h * D_K:(h + 1) * D_K] for h in range(HEADS)], axis=0)
        return th.reshape(Z, S, D_K)

    q_bh, k_bh, v_bh = to_heads(q), to_heads(k), to_heads(v)

    # ---- Batched logits for all (batch, head) pairs: (Z, S, S) f32 ----
    logits = jnp.einsum("zqd,zkd->zqk", q_bh, k_bh,
                        preferred_element_type=jnp.float32)

    if causal:
        # Built once per grid step, broadcast over Z.
        row = lax.broadcasted_iota(jnp.int32, (S, S), 0)
        col = lax.broadcasted_iota(jnp.int32, (S, S), 1)
        neg_mask = jnp.where(col <= row, 0.0, _MASK_VALUE).astype(jnp.float32)
        logits = logits + neg_mask[None, :, :]

    # ---- Batched softmax: single max / exp / sum / reciprocal over the whole stack ----
    logits = logits - jnp.max(logits, axis=-1, keepdims=True)
    p = jnp.exp(logits)
    p = p * pl.reciprocal(jnp.sum(p, axis=-1, keepdims=True), approx=True)

    # ---- Batched PV: (Z, S, S) @ (Z, S, d_k) -> (Z, S, d_k) f32 ----
    attn = jnp.einsum("zqk,zkd->zqd", p.astype(matmul_dtype), v_bh,
                      preferred_element_type=jnp.float32)

    # ---- Re-pack heads into the (R, D) context via masked lane-range stores into
    # VMEM scratch (bounds live ranges; no per-head output-projection matmuls).
    for h in range(HEADS):
        ctx_ref[:, h * D_K:(h + 1) * D_K] = (
            attn[h * b_blk:(h + 1) * b_blk].reshape(R, D_K))

    # ---- Output projection: ONE (R,64)@(64,64) matmul against the full w_out ----
    y = jnp.dot(ctx_ref[...].astype(matmul_dtype), wout_ref[...],
                preferred_element_type=jnp.float32)
    y = y + bout_ref[0] + x                    # bias + (identity) dropout + residual

    # ---- Fused one-pass LayerNorm: sum & sum-of-squares together ----
    inv_d = 1.0 / D_MODEL
    s1 = jnp.sum(y, axis=-1, keepdims=True)
    s2 = jnp.sum(y * y, axis=-1, keepdims=True)
    mean = s1 * inv_d
    var = s2 * inv_d - mean * mean
    y = (y - mean) * lax.rsqrt(var + LN_EPS)
    y = y * gamma_ref[0] + beta_ref[0]

    o_ref[...] = y.reshape(b_blk, S, D_MODEL)


def _num_tensorcores_per_chip():
    # v7x has 2 TensorCores per chip; v5e/v6e have 1.  Best-effort detection only.
    try:
        kind = jax.devices()[0].device_kind.lower()
    except Exception:
        return 1
    return 2 if ("v7" in kind or "7x" in kind) else 1


def _pick_b_blk(B, S):
    # Fold as many batch rows as possible into one grid step (fills the MXU M dim,
    # amortizes ~0.35us/step pipeline overhead), capped so per-step intermediates
    # (the (b_blk*HEADS, S, S) f32 probs, the (R, 3D) qkv slab, ...) stay small.
    max_rows = 1024
    b_blk = max(1, min(B, max(1, max_rows // max(S, 1))))
    while B % b_blk != 0:
        b_blk -= 1
    # Split into >=2 "parallel" grid blocks only on a 2-TC chip (v7x) and only when
    # each block still carries substantial work; on single-TC v5e/v6e fold maximally.
    if _num_tensorcores_per_chip() >= 2 and B // b_blk < 2 and B > 1:
        half = B // 2
        if half * S >= 256:
            while half > 0 and B % half != 0:
                half -= 1
            if half >= 1:
                b_blk = half
    return b_blk


def self_attention(x, w_qkv, b_qkv, w_out, b_out, gamma, beta, *,
                   causal=False, b_blk=None, matmul_dtype=jnp.bfloat16):
    """x: (B, S, D) float32.  Weights stored as (in, out) so compute is x @ W + b."""
    B, S, D = x.shape
    assert D == D_MODEL

    if b_blk is None:
        b_blk = _pick_b_blk(B, S)
    assert B % b_blk == 0
    grid = (B // b_blk,)

    kernel = functools.partial(_attention_kernel, b_blk=b_blk, seq_len=S,
                               causal=causal, matmul_dtype=matmul_dtype)

    # Weights in matmul dtype (cast once; resident VMEM blocks are then bf16).
    w_qkv_c = w_qkv.astype(matmul_dtype)
    w_out_c = w_out.astype(matmul_dtype)
    # Small vectors as 2-D f32 (biases / LN params stay on the f32 epilogue path).
    b_qkv2 = b_qkv.reshape(1, 3 * D).astype(jnp.float32)
    b_out2 = b_out.reshape(1, D).astype(jnp.float32)
    gamma2 = gamma.reshape(1, D).astype(jnp.float32)
    beta2 = beta.reshape(1, D).astype(jnp.float32)

    return pl.pallas_call(
        kernel,
        out_shape=jax.ShapeDtypeStruct((B, S, D), jnp.float32),
        grid_spec=pltpu.PrefetchScalarGridSpec(
            num_scalar_prefetch=0,
            grid=grid,
            in_specs=[
                pl.BlockSpec((b_blk, S, D), lambda i: (i, 0, 0)),   # x (per-block tile)
                pl.BlockSpec((D, 3 * D), lambda i: (0, 0)),         # w_qkv (resident)
                pl.BlockSpec((1, 3 * D), lambda i: (0, 0)),         # b_qkv
                pl.BlockSpec((D, D), lambda i: (0, 0)),             # w_out
                pl.BlockSpec((1, D), lambda i: (0, 0)),             # b_out
                pl.BlockSpec((1, D), lambda i: (0, 0)),             # ln gamma
                pl.BlockSpec((1, D), lambda i: (0, 0)),             # ln beta
            ],
            out_specs=pl.BlockSpec((b_blk, S, D), lambda i: (i, 0, 0)),
            scratch_shapes=[pltpu.VMEM((b_blk * S, D), jnp.float32)],  # head re-pack ctx
        ),
        compiler_params=pltpu.CompilerParams(
            dimension_semantics=("parallel",),
            # Raise above v5e's 16 MiB default scoped limit; comfortably below v7x's
            # 64 MiB physical VMEM.  TODO(synk): re-derive when flash-tiling large S.
            vmem_limit_bytes=32 * 1024 * 1024),
    )(x, w_qkv_c, b_qkv2, w_out_c, b_out2, gamma2, beta2)


def _reference(x, w_qkv, b_qkv, w_out, b_out, gamma, beta, causal=False):
    B, S, D = x.shape
    qkv = x @ w_qkv + b_qkv
    q, k, v = jnp.split(qkv, 3, axis=-1)

    def heads(t):
        return t.reshape(B, S, HEADS, D_K).transpose(0, 2, 1, 3)

    q, k, v = heads(q), heads(k), heads(v)
    A = jnp.einsum("bhqd,bhkd->bhqk", q, k) / SCALE
    if causal:
        mask = jnp.tril(jnp.ones((S, S)))
        A = jnp.where(mask == 0, -jnp.inf, A)
    A = jax.nn.softmax(A, axis=-1)
    o = jnp.einsum("bhqk,bhkd->bhqd", A, v)
    o = o.transpose(0, 2, 1, 3).reshape(B, S, D)
    o = o @ w_out + b_out
    o = o + x
    mean = jnp.mean(o, -1, keepdims=True)
    var = jnp.mean((o - mean) ** 2, -1, keepdims=True)
    return (o - mean) * lax.rsqrt(var + LN_EPS) * gamma + beta


if __name__ == "__main__":
    key = jax.random.PRNGKey(0)
    kx, k1, k2, k3, k4 = jax.random.split(key, 5)

    B, S = 2, 8
    x = jax.random.normal(kx, (B, S, D_MODEL), dtype=jnp.float32)

    # Deterministic parameter init (shapes from nn.Linear / nn.LayerNorm in __init__).
    lim_qkv = 1.0 / jnp.sqrt(jnp.float32(D_MODEL))
    w_qkv = jax.random.uniform(k1, (D_MODEL, 3 * D_MODEL), jnp.float32, -lim_qkv, lim_qkv)
    b_qkv = jax.random.uniform(k2, (3 * D_MODEL,), jnp.float32, -lim_qkv, lim_qkv)
    w_out = jax.random.uniform(k3, (D_MODEL, D_MODEL), jnp.float32, -lim_qkv, lim_qkv)
    b_out = jax.random.uniform(k4, (D_MODEL,), jnp.float32, -lim_qkv, lim_qkv)
    gamma = jnp.ones((D_MODEL,), jnp.float32)
    beta = jnp.zeros((D_MODEL,), jnp.float32)

    # Non-causal path (module default).
    out = self_attention(x, w_qkv, b_qkv, w_out, b_out, gamma, beta, causal=False)
    out = jax.block_until_ready(out)
    ref = _reference(x, w_qkv, b_qkv, w_out, b_out, gamma, beta, causal=False)
    # bf16 MXU operands (f32 accumulation) + approx reciprocal -> loosened tolerance.
    assert jnp.allclose(out, ref, atol=3e-2, rtol=3e-2), "mismatch vs. reference (causal=False)"

    # Causal path (exercises the hoisted finite -1e30 mask).
    out_c = self_attention(x, w_qkv, b_qkv, w_out, b_out, gamma, beta, causal=True)
    out_c = jax.block_until_ready(out_c)
    ref_c = _reference(x, w_qkv, b_qkv, w_out, b_out, gamma, beta, causal=True)
    assert jnp.allclose(out_c, ref_c, atol=3e-2, rtol=3e-2), "mismatch vs. reference (causal=True)"

    print("KERNEL_OK")
</pallas_src>

<mosaic_0001>
module attributes {stable_mosaic.version = 11 : i64} {
  func.func @_attention_kernel(%arg0: i32, %arg1: memref<2x8x64xf32, #tpu.memory_space<vmem>>, %arg2: memref<64x192xbf16, #tpu.memory_space<vmem>>, %arg3: memref<1x192xf32, #tpu.memory_space<vmem>>, %arg4: memref<64x64xbf16, #tpu.memory_space<vmem>>, %arg5: memref<1x64xf32, #tpu.memory_space<vmem>>, %arg6: memref<1x64xf32, #tpu.memory_space<vmem>>, %arg7: memref<1x64xf32, #tpu.memory_space<vmem>>, %arg8: memref<2x8x64xf32, #tpu.memory_space<vmem>>, %arg9: memref<16x64xf32, #tpu.memory_space<vmem>>) attributes {dimension_semantics = [#tpu.dimension_semantics<parallel>], iteration_bounds = array<i64: 1>, scalar_prefetch = 0 : i64, scratch_operands = 1 : i64, tpu.core_type = #tpu.core_type<tc>, window_params = [{transform_indices = @transform_0, window_bounds = array<i64: 2, 8, 64>}, {pipeline_mode = #tpu.pipeline_mode<synchronous>, transform_indices = @transform_1, window_bounds = array<i64: 64, 192>}, {pipeline_mode = #tpu.pipeline_mode<synchronous>, transform_indices = @transform_2, window_bounds = array<i64: 1, 192>}, {pipeline_mode = #tpu.pipeline_mode<synchronous>, transform_indices = @transform_3, window_bounds = array<i64: 64, 64>}, {pipeline_mode = #tpu.pipeline_mode<synchronous>, transform_indices = @transform_4, window_bounds = array<i64: 1, 64>}, {pipeline_mode = #tpu.pipeline_mode<synchronous>, transform_indices = @transform_5, window_bounds = array<i64: 1, 64>}, {pipeline_mode = #tpu.pipeline_mode<synchronous>, transform_indices = @transform_6, window_bounds = array<i64: 1, 64>}, {transform_indices = @transform_7, window_bounds = array<i64: 2, 8, 64>}]} {
    %c0 = arith.constant 0 : index
    %c0_0 = arith.constant 0 : index
    %c0_1 = arith.constant 0 : index
    %0 = vector.load %arg1[%c0, %c0_0, %c0_1] : memref<2x8x64xf32, #tpu.memory_space<vmem>>, vector<2x8x64xf32>
    %1 = vector.shape_cast %0 : vector<2x8x64xf32> to vector<16x64xf32>
    %2 = arith.truncf %1 : vector<16x64xf32> to vector<16x64xbf16>
    %c0_2 = arith.constant 0 : index
    %c0_3 = arith.constant 0 : index
    %3 = vector.load %arg2[%c0_2, %c0_3] : memref<64x192xbf16, #tpu.memory_space<vmem>>, vector<64x192xbf16>
    %cst = arith.constant dense<0.000000e+00> : vector<16x192xf32>
    %4 = tpu.matmul %2, %3, %cst {dimension_numbers = #tpu.dot_dimension_numbers<[1], [0], [0], [1], [0, 0, 1, 1], [], []>} : vector<16x64xbf16>, vector<64x192xbf16>, vector<16x192xf32> -> vector<16x192xf32>
    %c0_4 = arith.constant 0 : index
    %c0_5 = arith.constant 0 : index
    %5 = vector.load %arg3[%c0_4, %c0_5] : memref<1x192xf32, #tpu.memory_space<vmem>>, vector<1x192xf32>
    %6 = vector.shape_cast %5 : vector<1x192xf32> to vector<192xf32>
    %7 = vector.shape_cast %6 : vector<192xf32> to vector<1x192xf32>
    %8 = vector.broadcast %7 : vector<1x192xf32> to vector<16x192xf32>
    %9 = arith.addf %4, %8 : vector<16x192xf32>
    %10 = vector.extract_strided_slice %9 {offsets = [0, 0], sizes = [16, 64], strides = [1, 1]} : vector<16x192xf32> to vector<16x64xf32>
    %cst_6 = arith.constant 2.500000e-01 : f32
    %11 = vector.broadcast %cst_6 : f32 to vector<16x64xf32>
    %12 = arith.mulf %10, %11 : vector<16x64xf32>
    %13 = arith.truncf %12 : vector<16x64xf32> to vector<16x64xbf16>
    %14 = vector.extract_strided_slice %9 {offsets = [0, 64], sizes = [16, 64], strides = [1, 1]} : vector<16x192xf32> to vector<16x64xf32>
    %15 = arith.truncf %14 : vector<16x64xf32> to vector<16x64xbf16>
    %16 = vector.extract_strided_slice %9 {offsets = [0, 128], sizes = [16, 64], strides = [1, 1]} : vector<16x192xf32> to vector<16x64xf32>
    %17 = arith.truncf %16 : vector<16x64xf32> to vector<16x64xbf16>
    %18 = vector.extract_strided_slice %13 {offsets = [0, 0], sizes = [16, 16], strides = [1, 1]} : vector<16x64xbf16> to vector<16x16xbf16>
    %19 = vector.extract_strided_slice %13 {offsets = [0, 16], sizes = [16, 16], strides = [1, 1]} : vector<16x64xbf16> to vector<16x16xbf16>
    %20 = vector.extract_strided_slice %13 {offsets = [0, 32], sizes = [16, 16], strides = [1, 1]} : vector<16x64xbf16> to vector<16x16xbf16>
    %21 = vector.extract_strided_slice %13 {offsets = [0, 48], sizes = [16, 16], strides = [1, 1]} : vector<16x64xbf16> to vector<16x16xbf16>
    %22 = vector.shape_cast %18 : vector<16x16xbf16> to vector<1x16x16xbf16>
    %23 = vector.shape_cast %19 : vector<16x16xbf16> to vector<1x16x16xbf16>
    %24 = vector.shape_cast %20 : vector<16x16xbf16> to vector<1x16x16xbf16>
    %25 = vector.shape_cast %21 : vector<16x16xbf16> to vector<1x16x16xbf16>
    %26 = tpu.concatenate %22, %23, %24, %25 in 0 : vector<1x16x16xbf16>, vector<1x16x16xbf16>, vector<1x16x16xbf16>, vector<1x16x16xbf16> -> vector<4x16x16xbf16>
    %27 = vector.shape_cast %26 : vector<4x16x16xbf16> to vector<8x8x16xbf16>
    %28 = vector.extract_strided_slice %15 {offsets = [0, 0], sizes = [16, 16], strides = [1, 1]} : vector<16x64xbf16> to vector<16x16xbf16>
    %29 = vector.extract_strided_slice %15 {offsets = [0, 16], sizes = [16, 16], strides = [1, 1]} : vector<16x64xbf16> to vector<16x16xbf16>
    %30 = vector.extract_strided_slice %15 {offsets = [0, 32], sizes = [16, 16], strides = [1, 1]} : vector<16x64xbf16> to vector<16x16xbf16>
    %31 = vector.extract_strided_slice %15 {offsets = [0, 48], sizes = [16, 16], strides = [1, 1]} : vector<16x64xbf16> to vector<16x16xbf16>
    %32 = vector.shape_cast %28 : vector<16x16xbf16> to vector<1x16x16xbf16>
    %33 = vector.shape_cast %29 : vector<16x16xbf16> to vector<1x16x16xbf16>
    %34 = vector.shape_cast %30 : vector<16x16xbf16> to vector<1x16x16xbf16>
    %35 = vector.shape_cast %31 : vector<16x16xbf16> to vector<1x16x16xbf16>
    %36 = tpu.concatenate %32, %33, %34, %35 in 0 : vector<1x16x16xbf16>, vector<1x16x16xbf16>, vector<1x16x16xbf16>, vector<1x16x16xbf16> -> vector<4x16x16xbf16>
    %37 = vector.shape_cast %36 : vector<4x16x16xbf16> to vector<8x8x16xbf16>
    %38 = vector.extract_strided_slice %17 {offsets = [0, 0], sizes = [16, 16], strides = [1, 1]} : vector<16x64xbf16> to vector<16x16xbf16>
    %39 = vector.extract_strided_slice %17 {offsets = [0, 16], sizes = [16, 16], strides = [1, 1]} : vector<16x64xbf16> to vector<16x16xbf16>
    %40 = vector.extract_strided_slice %17 {offsets = [0, 32], sizes = [16, 16], strides = [1, 1]} : vector<16x64xbf16> to vector<16x16xbf16>
    %41 = vector.extract_strided_slice %17 {offsets = [0, 48], sizes = [16, 16], strides = [1, 1]} : vector<16x64xbf16> to vector<16x16xbf16>
    %42 = vector.shape_cast %38 : vector<16x16xbf16> to vector<1x16x16xbf16>
    %43 = vector.shape_cast %39 : vector<16x16xbf16> to vector<1x16x16xbf16>
    %44 = vector.shape_cast %40 : vector<16x16xbf16> to vector<1x16x16xbf16>
    %45 = vector.shape_cast %41 : vector<16x16xbf16> to vector<1x16x16xbf16>
    %46 = tpu.concatenate %42, %43, %44, %45 in 0 : vector<1x16x16xbf16>, vector<1x16x16xbf16>, vector<1x16x16xbf16>, vector<1x16x16xbf16> -> vector<4x16x16xbf16>
    %47 = vector.shape_cast %46 : vector<4x16x16xbf16> to vector<8x8x16xbf16>
    "tpu.trace_start"() <{level = 10 : i32, message = "zqd,zkd->zqk"}> : () -> ()
    %cst_7 = arith.constant dense<0.000000e+00> : vector<8x8x8xf32>
    %48 = tpu.matmul %27, %37, %cst_7 {dimension_numbers = #tpu.dot_dimension_numbers<[2], [2], [1], [1], [0, 0, 0, 1, 1, 1], [0], [0]>} : vector<8x8x16xbf16>, vector<8x8x16xbf16>, vector<8x8x8xf32> -> vector<8x8x8xf32>
    "tpu.trace_stop"() : () -> ()
    %cst_8 = arith.constant dense<0xFF800000> : vector<8x8xf32>
    %49 = vector.multi_reduction <maximumf>, %48, %cst_8 [2] : vector<8x8x8xf32> to vector<8x8xf32>
    %50 = vector.shape_cast %49 : vector<8x8xf32> to vector<8x8x1xf32>
    %51 = vector.broadcast %50 : vector<8x8x1xf32> to vector<8x8x8xf32>
    %52 = arith.subf %48, %51 : vector<8x8x8xf32>
    %53 = math.exp %52 : vector<8x8x8xf32>
    %cst_9 = arith.constant dense<0.000000e+00> : vector<8x8xf32>
    %54 = vector.multi_reduction <add>, %53, %cst_9 [2] : vector<8x8x8xf32> to vector<8x8xf32>
    %55 = vector.shape_cast %54 : vector<8x8xf32> to vector<8x8x1xf32>
    %56 = tpu.reciprocal %55 {approx = true} : vector<8x8x1xf32> -> vector<8x8x1xf32>
    %57 = vector.broadcast %56 : vector<8x8x1xf32> to vector<8x8x8xf32>
    %58 = arith.mulf %53, %57 : vector<8x8x8xf32>
    %59 = arith.truncf %58 : vector<8x8x8xf32> to vector<8x8x8xbf16>
    "tpu.trace_start"() <{level = 10 : i32, message = "zqk,zkd->zqd"}> : () -> ()
    %cst_10 = arith.constant dense<0.000000e+00> : vector<8x8x16xf32>
    %60 = tpu.matmul %59, %47, %cst_10 {dimension_numbers = #tpu.dot_dimension_numbers<[2], [1], [1], [2], [0, 0, 0, 1, 1, 2], [0], [0]>} : vector<8x8x8xbf16>, vector<8x8x16xbf16>, vector<8x8x16xf32> -> vector<8x8x16xf32>
    "tpu.trace_stop"() : () -> ()
    %61 = vector.extract_strided_slice %60 {offsets = [0, 0, 0], sizes = [2, 8, 16], strides = [1, 1, 1]} : vector<8x8x16xf32> to vector<2x8x16xf32>
    %62 = vector.shape_cast %61 : vector<2x8x16xf32> to vector<16x16xf32>
    %c0_11 = arith.constant 0 : index
    %c0_12 = arith.constant 0 : index
    %63 = vector.load %arg9[%c0_11, %c0_12] : memref<16x64xf32, #tpu.memory_space<vmem>>, vector<16x16xf32>
    tpu.vector_store %arg9[%c0_11, %c0_12], %62 {strides = array<i32>} : memref<16x64xf32, #tpu.memory_space<vmem>>, vector<16x16xf32>,
    %64 = vector.extract_strided_slice %60 {offsets = [2, 0, 0], sizes = [2, 8, 16], strides = [1, 1, 1]} : vector<8x8x16xf32> to vector<2x8x16xf32>
    %65 = vector.shape_cast %64 : vector<2x8x16xf32> to vector<16x16xf32>
    %c0_13 = arith.constant 0 : index
    %c16 = arith.constant 16 : index
    %66 = vector.load %arg9[%c0_13, %c16] : memref<16x64xf32, #tpu.memory_space<vmem>>, vector<16x16xf32>
    tpu.vector_store %arg9[%c0_13, %c16], %65 {strides = array<i32>} : memref<16x64xf32, #tpu.memory_space<vmem>>, vector<16x16xf32>,
    %67 = vector.extract_strided_slice %60 {offsets = [4, 0, 0], sizes = [2, 8, 16], strides = [1, 1, 1]} : vector<8x8x16xf32> to vector<2x8x16xf32>
    %68 = vector.shape_cast %67 : vector<2x8x16xf32> to vector<16x16xf32>
    %c0_14 = arith.constant 0 : index
    %c32 = arith.constant 32 : index
    %69 = vector.load %arg9[%c0_14, %c32] : memref<16x64xf32, #tpu.memory_space<vmem>>, vector<16x16xf32>
    tpu.vector_store %arg9[%c0_14, %c32], %68 {strides = array<i32>} : memref<16x64xf32, #tpu.memory_space<vmem>>, vector<16x16xf32>,
    %70 = vector.extract_strided_slice %60 {offsets = [6, 0, 0], sizes = [2, 8, 16], strides = [1, 1, 1]} : vector<8x8x16xf32> to vector<2x8x16xf32>
    %71 = vector.shape_cast %70 : vector<2x8x16xf32> to vector<16x16xf32>
    %c0_15 = arith.constant 0 : index
    %c48 = arith.constant 48 : index
    %72 = vector.load %arg9[%c0_15, %c48] : memref<16x64xf32, #tpu.memory_space<vmem>>, vector<16x16xf32>
    tpu.vector_store %arg9[%c0_15, %c48], %71 {strides = array<i32>} : memref<16x64xf32, #tpu.memory_space<vmem>>, vector<16x16xf32>,
    %c0_16 = arith.constant 0 : index
    %c0_17 = arith.constant 0 : index
    %73 = vector.load %arg9[%c0_16, %c0_17] : memref<16x64xf32, #tpu.memory_space<vmem>>, vector<16x64xf32>
    %74 = arith.truncf %73 : vector<16x64xf32> to vector<16x64xbf16>
    %c0_18 = arith.constant 0 : index
    %c0_19 = arith.constant 0 : index
    %75 = vector.load %arg4[%c0_18, %c0_19] : memref<64x64xbf16, #tpu.memory_space<vmem>>, vector<64x64xbf16>
    %cst_20 = arith.constant dense<0.000000e+00> : vector<16x64xf32>
    %76 = tpu.matmul %74, %75, %cst_20 {dimension_numbers = #tpu.dot_dimension_numbers<[1], [0], [0], [1], [0, 0, 1, 1], [], []>} : vector<16x64xbf16>, vector<64x64xbf16>, vector<16x64xf32> -> vector<16x64xf32>
    %c0_21 = arith.constant 0 : index
    %c0_22 = arith.constant 0 : index
    %77 = vector.load %arg5[%c0_21, %c0_22] : memref<1x64xf32, #tpu.memory_space<vmem>>, vector<1x64xf32>
    %78 = vector.shape_cast %77 : vector<1x64xf32> to vector<64xf32>
    %79 = vector.shape_cast %78 : vector<64xf32> to vector<1x64xf32>
    %80 = vector.broadcast %79 : vector<1x64xf32> to vector<16x64xf32>
    %81 = arith.addf %76, %80 : vector<16x64xf32>
    %82 = arith.addf %81, %1 : vector<16x64xf32>
    %cst_23 = arith.constant dense<0.000000e+00> : vector<16xf32>
    %83 = vector.multi_reduction <add>, %82, %cst_23 [1] : vector<16x64xf32> to vector<16xf32>
    %84 = vector.shape_cast %83 : vector<16xf32> to vector<16x1xf32>
    %85 = arith.mulf %82, %82 : vector<16x64xf32>
    %cst_24 = arith.constant dense<0.000000e+00> : vector<16xf32>
    %86 = vector.multi_reduction <add>, %85, %cst_24 [1] : vector<16x64xf32> to vector<16xf32>
    %87 = vector.shape_cast %86 : vector<16xf32> to vector<16x1xf32>
    %cst_25 = arith.constant 1.562500e-02 : f32
    %88 = vector.broadcast %cst_25 : f32 to vector<16x1xf32>
    %89 = arith.mulf %84, %88 : vector<16x1xf32>
    %cst_26 = arith.constant 1.562500e-02 : f32
    %90 = vector.broadcast %cst_26 : f32 to vector<16x1xf32>
    %91 = arith.mulf %87, %90 : vector<16x1xf32>
    %92 = arith.mulf %89, %89 : vector<16x1xf32>
    %93 = arith.subf %91, %92 : vector<16x1xf32>
    %94 = vector.broadcast %89 : vector<16x1xf32> to vector<16x64xf32>
    %95 = arith.subf %82, %94 : vector<16x64xf32>
    %cst_27 = arith.constant 9.99999974E-6 : f32
    %96 = vector.broadcast %cst_27 : f32 to vector<16x1xf32>
    %97 = arith.addf %93, %96 : vector<16x1xf32>
    %98 = math.rsqrt %97 : vector<16x1xf32>
    %99 = vector.broadcast %98 : vector<16x1xf32> to vector<16x64xf32>
    %100 = arith.mulf %95, %99 : vector<16x64xf32>
    %c0_28 = arith.constant 0 : index
    %c0_29 = arith.constant 0 : index
    %101 = vector.load %arg6[%c0_28, %c0_29] : memref<1x64xf32, #tpu.memory_space<vmem>>, vector<1x64xf32>
    %102 = vector.shape_cast %101 : vector<1x64xf32> to vector<64xf32>
    %103 = vector.shape_cast %102 : vector<64xf32> to vector<1x64xf32>
    %104 = vector.broadcast %103 : vector<1x64xf32> to vector<16x64xf32>
    %105 = arith.mulf %100, %104 : vector<16x64xf32>
    %c0_30 = arith.constant 0 : index
    %c0_31 = arith.constant 0 : index
    %106 = vector.load %arg7[%c0_30, %c0_31] : memref<1x64xf32, #tpu.memory_space<vmem>>, vector<1x64xf32>
    %107 = vector.shape_cast %106 : vector<1x64xf32> to vector<64xf32>
    %108 = vector.shape_cast %107 : vector<64xf32> to vector<1x64xf32>
    %109 = vector.broadcast %108 : vector<1x64xf32> to vector<16x64xf32>
    %110 = arith.addf %105, %109 : vector<16x64xf32>
    %111 = vector.shape_cast %110 : vector<16x64xf32> to vector<2x8x64xf32>
    %c0_32 = arith.constant 0 : index
    %c0_33 = arith.constant 0 : index
    %c0_34 = arith.constant 0 : index
    %112 = vector.load %arg8[%c0_32, %c0_33, %c0_34] : memref<2x8x64xf32, #tpu.memory_space<vmem>>, vector<2x8x64xf32>
    tpu.vector_store %arg8[%c0_32, %c0_33, %c0_34], %111 {strides = array<i32>} : memref<2x8x64xf32, #tpu.memory_space<vmem>>, vector<2x8x64xf32>,
    return
  }
  func.func @transform_0(%arg0: i32) -> (i32, i32, i32) {
    %c0_i32 = arith.constant 0 : i32
    %c0_i32_0 = arith.constant 0 : i32
    %c0_i32_1 = arith.constant 0 : i32
    return %arg0, %c0_i32, %c0_i32_0 : i32, i32, i32
  }
  func.func @transform_1(%arg0: i32) -> (i32, i32) {
    %c0_i32 = arith.constant 0 : i32
    %c0_i32_0 = arith.constant 0 : i32
    %c0_i32_1 = arith.constant 0 : i32
    return %c0_i32, %c0_i32_0 : i32, i32
  }
  func.func @transform_2(%arg0: i32) -> (i32, i32) {
    %c0_i32 = arith.constant 0 : i32
    %c0_i32_0 = arith.constant 0 : i32
    %c0_i32_1 = arith.constant 0 : i32
    return %c0_i32, %c0_i32_0 : i32, i32
  }
  func.func @transform_3(%arg0: i32) -> (i32, i32) {
    %c0_i32 = arith.constant 0 : i32
    %c0_i32_0 = arith.constant 0 : i32
    %c0_i32_1 = arith.constant 0 : i32
    return %c0_i32, %c0_i32_0 : i32, i32
  }
  func.func @transform_4(%arg0: i32) -> (i32, i32) {
    %c0_i32 = arith.constant 0 : i32
    %c0_i32_0 = arith.constant 0 : i32
    %c0_i32_1 = arith.constant 0 : i32
    return %c0_i32, %c0_i32_0 : i32, i32
  }
  func.func @transform_5(%arg0: i32) -> (i32, i32) {
    %c0_i32 = arith.constant 0 : i32
    %c0_i32_0 = arith.constant 0 : i32
    %c0_i32_1 = arith.constant 0 : i32
    return %c0_i32, %c0_i32_0 : i32, i32
  }
  func.func @transform_6(%arg0: i32) -> (i32, i32) {
    %c0_i32 = arith.constant 0 : i32
    %c0_i32_0 = arith.constant 0 : i32
    %c0_i32_1 = arith.constant 0 : i32
    return %c0_i32, %c0_i32_0 : i32, i32
  }
  func.func @transform_7(%arg0: i32) -> (i32, i32, i32) {
    %c0_i32 = arith.constant 0 : i32
    %c0_i32_0 = arith.constant 0 : i32
    %c0_i32_1 = arith.constant 0 : i32
    return %arg0, %c0_i32, %c0_i32_0 : i32, i32, i32
  }
}

</mosaic_0001>

<bundles_post_ra>
// kernel: tpu_custom_call.1
= control target key start
LH: loop header
LB: loop body
LE: loop exit
PB: predicated region body
PF: predicated region fallthrough
CT: control target
= control target key end

     0   :  { %12 = vsyncpa [#allocation4], 0  ;;  %s1969_s0 = inlined_call_operand.hbm [shape: f32[2,8,64], index: 0, kind: input, shape index: {}]   ;;  %s1970_s1 = inlined_call_operand.hbm [shape: bf16[64,192], index: 1, kind: input, shape index: {}]   ;;  %s1971_s2 = inlined_call_operand.vmem [shape: f32[1,192], index: 2, kind: input, shape index: {}]   ;;  %s1972_s3 = inlined_call_operand.hbm [shape: bf16[64,64], index: 3, kind: input, shape index: {}]   ;;  %s1973_s4 = inlined_call_operand.vmem [shape: f32[1,64], index: 4, kind: input, shape index: {}]   ;;  %s1974_s5 = inlined_call_operand.vmem [shape: f32[1,64], index: 5, kind: input, shape index: {}]   ;;  %s1975_s6 = inlined_call_operand.vmem [shape: f32[1,64], index: 6, kind: input, shape index: {}]   ;;  %s1976_s7 = inlined_call_operand.hbm [shape: f32[2,8,64], index: 7, kind: output, shape index: {}]  }
   0x1   :  { %13 = vsyncpa [#allocation7], 0 }
   0x2   :  { %14 = vsyncpa [#allocation5], 0  ;;  %s1666_s24 = smov [#allocation6]   ;;  %s1667_s26 = smov [#allocation3]  }
   0x3   :  { %s32_s25 = sshll.u32 %s1666_s24, 4  ;;  %s20_s27 = sshll.u32 %s1667_s26, 4  ;;  %s33_s25 = int_to_ptr.vmem [resolvable:$true] %s32_s25  ;;  %s1723_s27 = int_to_ptr.vmem [resolvable:$true] %s20_s27 }
   0x4   :  { %s1572_s30 = scalar_lea.hbm %s1970_s1, 1024 }
   0x5   :  { %p1573_p0 = scmp.ne.s32.totalorder %s1970_s1, %s1572_s30  ;;  %p1576_p1 = scmp.lt.u32.totalorder %s1572_s30, %s1970_s1 }
   0x7   :  { %p1578_p2 = pnand %p1576_p1, %p1573_p0 }
   0x9   :  { %1581 = shalt.err (!%p1578_p2)
}
   0xa   :  { %s1582_s12 = scalar_lea.vmem %s33_s25, 1024  ;;  %p1587_p4 = scmp.lt.s32.totalorder %s33_s25, %s33_s25 }
   0xb   :  { %p1583_p3 = scmp.ne.s32.totalorder %s33_s25, %s1582_s12  ;;  %p1588_p5 = scmp.lt.s32.totalorder %s1582_s12, %s1582_s12 }
   0xd   :  { %p1589_p6 = por %p1588_p5, %p1587_p4 }
   0xf   :  { %p1590_p7 = pnand %p1589_p6, %p1583_p3 }
  0x11   :  { %1593 = shalt.err (!%p1590_p7)
}
  0x12   :  { %s1668_s13 = smov 128   ;;  %s1669_s14 = smov 8  }
  0x13   :  { %38 = dma.hbm_to_vmem [thread:$0]  %s1970_s1, 1024, %s33_s25, [#allocation7], %s1668_s13, %s1668_s13, %s1669_s14  }
  0x14   :  { %s1594_s19 = scalar_lea.hbm %s1969_s0, 256 }
  0x15   :  { %p1595_p8 = scmp.ne.s32.totalorder %s1969_s0, %s1594_s19  ;;  %p1598_p9 = scmp.lt.u32.totalorder %s1594_s19, %s1969_s0 }
  0x17   :  { %p1600_p10 = pnand %p1598_p9, %p1595_p8 }
  0x19   :  { %1603 = shalt.err (!%p1600_p10)
}
  0x1a   :  { %s1604_s24 = scalar_lea.vmem %s1723_s27, 256  ;;  %p1609_p12 = scmp.lt.s32.totalorder %s1723_s27, %s1723_s27 }
  0x1b   :  { %p1605_p11 = scmp.ne.s32.totalorder %s1723_s27, %s1604_s24  ;;  %p1610_p13 = scmp.lt.s32.totalorder %s1604_s24, %s1604_s24 }
  0x1d   :  { %p1611_p0 = por %p1610_p13, %p1609_p12 }
  0x1f   :  { %p1612_p1 = pnand %p1611_p0, %p1605_p11 }
  0x21   :  { %1615 = shalt.err (!%p1612_p1)
}
  0x22   :  { %26 = dma.hbm_to_vmem [thread:$0]  %s1969_s0, 256, %s1723_s27, [#allocation4], %s1668_s13, %s1668_s13, %s1669_s14  }
  0x23   :  { %s1670_s26 = smov [#allocation8]   ;;  %s1616_s8 = scalar_lea.hbm %s1972_s3, 512 }
  0x24   :  { %s46_s28 = sshll.u32 %s1670_s26, 4  ;;  %p1617_p2 = scmp.ne.s32.totalorder %s1972_s3, %s1616_s8  ;;  %s47_s28 = int_to_ptr.vmem [resolvable:$true] %s46_s28 }
  0x25   :  { %p1620_p3 = scmp.lt.u32.totalorder %s1616_s8, %s1972_s3 }
  0x27   :  { %p1622_p4 = pnand %p1620_p3, %p1617_p2 }
  0x29   :  { %1625 = shalt.err (!%p1622_p4)
}
  0x2a   :  { %s1626_s15 = scalar_lea.vmem %s47_s28, 512  ;;  %p1631_p6 = scmp.lt.s32.totalorder %s47_s28, %s47_s28 }
  0x2b   :  { %p1627_p5 = scmp.ne.s32.totalorder %s47_s28, %s1626_s15  ;;  %p1632_p7 = scmp.lt.s32.totalorder %s1626_s15, %s1626_s15 }
  0x2d   :  { %p1633_p8 = por %p1632_p7, %p1631_p6 }
  0x2f   :  { %p1634_p9 = pnand %p1633_p8, %p1627_p5 }
  0x31   :  { %1637 = shalt.err (!%p1634_p9)
}
  0x32   :  { %s1671_s0 = smov 64   ;;  %s1672_s27 = smov 4  }
  0x33   :  { %52 = dma.hbm_to_vmem [thread:$0]  %s1972_s3, 512, %s47_s28, [#allocation7], %s1671_s0, %s1671_s0, %s1672_s27  }
  0x34   :  { %1660 = dma.done.wait [#allocation4], 256  }
  0x35   :  { %1661 = vsyncadd [#allocation4], 4294967040 }
  0x36   :  { %1662 = dma.done.wait [#allocation7], 1536  }
  0x37   :  { %1663 = vsyncadd [#allocation7], 4294965760  ;;  %v1673_v0 = vmov 0   ;;  %v1520_v1 = vld [vmem:[#allocation6 + $0x4] ss:$8 sps:$4 sm:$0xff]   ;;  %v1774_v9 = vld [vmem:[#allocation3] sm:$0xff]  ;;  %v82_v12 = vlaneseq }
  0x38   :  { %168 = vmatprep.mubr.bf16.mxu0 %v1673_v0  ;;  %v1522_v2 = vld [vmem:[#allocation6] ss:$8 sps:$4 sm:$0xff]   ;;  %136 = vmatprep.subr.bf16.mxu0 %v1520_v1  ;;  %v1523_v3 = vld [vmem:[#allocation6 + $0x14] ss:$8 sps:$4 sm:$0xff]   ;;  %v1525_v4 = vld [vmem:[#allocation6 + $0x10] ss:$8 sps:$4 sm:$0xff]  }
  0x39   :  { %137 = vmatpush1.bf16.msra.mxu0 %v1522_v2  ;;  %v1526_v5 = vld [vmem:[#allocation6 + $0x24] ss:$8 sps:$4 sm:$0xff]   ;;  %v1528_v6 = vld [vmem:[#allocation6 + $0x20] ss:$8 sps:$4 sm:$0xff]   ;;  %v1529_v7 = vld [vmem:[#allocation6 + $0x34] ss:$8 sps:$4 sm:$0xff]  }
  0x3a   :  { %138 = vmatprep.subr.bf16.mxu0 %v1523_v3  ;;  %v1531_v8 = vld [vmem:[#allocation6 + $0x30] ss:$8 sps:$4 sm:$0xff]   ;;  %vm132_vm0 = vcmask 523264   ;;  %v83_v13 = vshrl.u32 %v82_v12, 7  ;;  %v80_v15 = vld [vmem:[%s1971_s2] sm:$0x3] }
  0x3b   :  { %v1776_v10 = vld [vmem:[#allocation3 + $0x8] sm:$0xff]  ;;  %v1674_v18 = vmov 0.0   ;;  %vm1675_vm1 = vmmov 0   ;;  %s1676_s2 = smov 80   ;;  %s1677_s19 = smov 112   ;;  %vm248_vm2 = vcmask 130048  }
  0x3c   :  { %v71_v11 = vpack.c.bf16 %v1776_v10, %v1774_v9  ;;  %v84_v14 = vsub.s32 0, %v83_v13  ;;  %v88_v16 = vsub.s32 1, %v83_v13  ;;  %1395 = vmatprep.subr.bf16.mxu1 %v1674_v18  ;;  %1397 = vmatprep.mubr.msk.bf16.mxu1 %vm1675_vm1, %v1674_v18  ;;  %s1678_s20 = smov 96   ;;  %vm738_vm3 = vcmask 1043456   ;;  %s1679_s21 = smov 16  }
  0x3d   :  { %139 = vmatpush1.bf16.msra.mxu0 %v1525_v4  ;;  %vm638_vm4 = vcmask 64512   ;;  %s1680_s22 = smov 32   ;;  %s1681_s23 = smov 48   ;;  %vm1114_vm5 = vcmask 261248   ;;  %vm1125_vm6 = vcmask 392448   ;;  %vm1136_vm7 = vcmask 523648  }
  0x3e   :  { %140 = vmatprep.subr.bf16.mxu0 %v1526_v5  ;;  %v85_v17 = vrot.slane %v80_v15, %v84_v14  ;;  %v89_v20 = vrot.slane %v80_v15, %v88_v16  ;;  %s1682_s29 = smov [#allocation9]  }
  0x3f   :  { %s1282_s30 = sshll.u32 %s1682_s29, 4  ;;  %s1283_s30 = int_to_ptr.vmem [resolvable:$true] %s1282_s30 }
  0x40   :  { %p1643_p11 = scmp.lt.s32.totalorder %s1283_s30, %s1283_s30 }
  0x41   :  { %141 = vmatpush1.bf16.msra.mxu0 %v1528_v6 }
  0x42   :  { %142 = vmatprep.subr.bf16.mxu0 %v1529_v7 }
  0x45   :  { %143 = vmatpush1.bf16.msra.mxu0 %v1531_v8 }
  0x46   :  { %1419 = vmatprep.subr.bf16.mxu0 %v1674_v18 }
  0x48   :  { %1303 = vmatmul.mubr.msk.bf16.vlgmr.msra.gmra.mrb[0].mxu0 %vm132_vm0, %v71_v11 }
  0x49   :  { %1421 = vmatprep.mubr.msk.bf16.mxu0 %vm1675_vm1, %v1674_v18 }
 0x11b   :  { %v170_v19 = vpop.f32.mrb[0].mxu0 }
 0x11c   :  { %v171_v21 = vadd.f32 %v170_v19, %v85_v17  ;;  %v172_v22 = vpop.f32.mrb[1].mxu0 }
 0x11d   :  { %v174_v23 = vpop.f32.mrb[2].mxu0  ;;  %v1786_v26 = vadd.f32 %v172_v22, %v89_v20 }
 0x11e   :  { %v175_v24 = vadd.f32 %v174_v23, %v85_v17  ;;  %v176_v25 = vpop.f32.mrb[3].mxu0  ;;  %v179_v28 = vmul.f32 0.25, %v171_v21  ;;  %v1356_v33 = vpack.c.bf16 %v171_v21, %v171_v21 }
 0x11f   :  { %v1788_v27 = vadd.f32 %v176_v25, %v89_v20  ;;  %v1354_v1 = vpack.c.bf16 %v1786_v26, %v1786_v26 }
 0x120   :  { %v180_v29 = vmul.f32 0.25, %v175_v24  ;;  %v182_v30 = vpack.c.bf16 %v175_v24, %v171_v21  ;;  %v1357_v34 = vpack.c.bf16 %v175_v24, %v175_v24  ;;  %v1352_v45 = vpack.c.bf16 %v179_v28, %v179_v28 }
 0x121   :  { %v1796_v31 = vpack.c.bf16 %v1788_v27, %v1786_v26  ;;  %v740_v4 = vsel %vm738_vm3, %v1354_v1, 0  ;;  %v1355_v8 = vpack.c.bf16 %v1788_v27, %v1788_v27 }
 0x122   :  { %212 = vrot.lane.b32.xlu1 %v182_v30, %s1676_s2  ;;  %208 = vrot.lane.b32.xlu0 %v182_v30, %s1677_s19  ;;  %v181_v32 = vpack.c.bf16 %v180_v29, %v179_v28  ;;  %v1353_v49 = vpack.c.bf16 %v180_v29, %v180_v29 }
 0x123   :  { %v786_v12 = vsel %vm738_vm3, %v1355_v8, 0 }
 0x126   :  { %246 = vrot.lane.b32.xlu1 %v1356_v33, %s1671_s0  ;;  %210 = vrot.lane.b32.xlu0 %v182_v30, %s1678_s20 }
 0x12a   :  { %296 = vrot.lane.b32.xlu0 %v1357_v34, %s1671_s0 }
 0x12e   :  { %185 = vrot.lane.b32.xlu0 %v181_v32, %s1677_s19 }
 0x194   :  { %v213_v35 = vpop.permute.xlu1 %212  ;;  %v209_v36 = vpop.permute.xlu0 %208 }
 0x195   :  { %v1324_v37 = vcombine.low %v209_v36, %v209_v36  ;;  %v1326_v41 = vcombine.high %v209_v36, %v209_v36  ;;  %v1332_v47 = vcombine.low %v213_v35, %v213_v35  ;;  %v1334_v48 = vcombine.high %v213_v35, %v213_v35 }
 0x197   :  { %345 = vrot.lane.b32.xlu1 %v1324_v37, %s1671_s0 }
 0x198   :  { %v247_v38 = vpop.permute.xlu1 %246  ;;  %v211_v39 = vpop.permute.xlu0 %210 }
 0x199   :  { %v253_v40 = vsel %vm248_vm2, %v247_v38, 0  ;;  %v1328_v42 = vcombine.low %v211_v39, %v211_v39  ;;  %v1330_v43 = vcombine.high %v211_v39, %v211_v39 }
 0x19a   :  { %1396 = vmatpush3.bf16.xpose.msra.mxu1 %v253_v40 }
 0x19b   :  { %394 = vrot.lane.b32.xlu1 %v1326_v41, %s1671_s0  ;;  %443 = vrot.lane.b32.xlu0 %v1328_v42, %s1671_s0 }
 0x19c   :  { %1401 = vmatprep.subr.bf16.mxu1 %v1674_v18  ;;  %v297_v44 = vpop.permute.xlu0 %296 }
 0x19d   :  { %v302_v46 = vsel %vm248_vm2, %v297_v44, 0 }
 0x19f   :  { %492 = vrot.lane.b32.xlu1 %v1330_v43, %s1671_s0  ;;  %187 = vrot.lane.b32.xlu0 %v181_v32, %s1678_s20 }
 0x1a0   :  { %v186_v50 = vpop.permute.xlu0 %185 }
 0x1a1   :  { %1398 = vmatmul.mubr.msk.bf16.vlgmr.msra.gmra.mrb[0].mxu1 %vm248_vm2, %v1352_v45  ;;  %v1306_v56 = vcombine.low %v186_v50, %v186_v50  ;;  %v1307_v63 = vcombine.high %v186_v50, %v186_v50 }
 0x1a2   :  { %1402 = vmatpush3.bf16.xpose.msra.mxu1 %v302_v46  ;;  %1403 = vmatprep.mubr.msk.bf16.mxu1 %vm1675_vm1, %v1674_v18 }
 0x1a3   :  { %541 = vrot.lane.b32.xlu1 %v1332_v47, %s1671_s0  ;;  %590 = vrot.lane.b32.xlu0 %v1334_v48, %s1671_s0 }
 0x1a4   :  { %1407 = vmatprep.subr.bf16.mxu1 %v1674_v18 }
 0x1a7   :  { %189 = vrot.lane.b32.xlu1 %v181_v32, %s1676_s2 }
 0x1a9   :  { %1404 = vmatmul.mubr.msk.bf16.vlgmr.msra.gmra.mrb[4].mxu1 %vm248_vm2, %v1353_v49 }
 0x1aa   :  { %1409 = vmatprep.mubr.msk.bf16.mxu1 %vm1675_vm1, %v1674_v18 }
 0x209   :  { %v346_v51 = vpop.permute.xlu1 %345 }
 0x20a   :  { %v351_v52 = vsel %vm248_vm2, %v346_v51, 0 }
 0x20b   :  { %1408 = vmatpush3.bf16.xpose.msra.mxu1 %v351_v52 }
 0x20c   :  { %1413 = vmatprep.subr.bf16.mxu1 %v1674_v18 }
 0x20d   :  { %v395_v53 = vpop.permute.xlu1 %394  ;;  %v444_v54 = vpop.permute.xlu0 %443 }
 0x20e   :  { %v449_v55 = vsel %vm248_vm2, %v444_v54, 0  ;;  %v400_v59 = vsel %vm248_vm2, %v395_v53, 0 }
 0x20f   :  { %1420 = vmatpush3.bf16.xpose.msra.mxu0 %v449_v55 }
 0x210   :  { %1431 = vmatprep.subr.bf16.mxu0 %v1674_v18 }
 0x211   :  { %v493_v57 = vpop.permute.xlu1 %492  ;;  %v188_v58 = vpop.permute.xlu0 %187 }
 0x212   :  { %1410 = vmatmul.mubr.msk.bf16.vlgmr.msra.gmra.mrb[8].mxu1 %vm248_vm2, %v1306_v56  ;;  %v1308_v60 = vcombine.low %v188_v58, %v188_v58  ;;  %v498_v2 = vsel %vm248_vm2, %v493_v57, 0  ;;  %v1309_v6 = vcombine.high %v188_v58, %v188_v58 }
 0x213   :  { %1414 = vmatpush3.bf16.xpose.msra.mxu1 %v400_v59  ;;  %1415 = vmatprep.mubr.msk.bf16.mxu1 %vm1675_vm1, %v1674_v18 }
 0x214   :  { %1425 = vmatprep.subr.bf16.mxu1 %v1674_v18 }
 0x215   :  { %v542_v61 = vpop.permute.xlu1 %541  ;;  %v591_v5 = vpop.permute.xlu0 %590 }
 0x216   :  { %v547_v62 = vsel %vm248_vm2, %v542_v61, 0  ;;  %1422 = vmatmul.mubr.msk.bf16.vlgmr.msra.gmra.mrb[4].mxu0 %vm248_vm2, %v1308_v60  ;;  %v596_v7 = vsel %vm248_vm2, %v591_v5, 0 }
 0x217   :  { %1432 = vmatpush3.bf16.xpose.msra.mxu0 %v547_v62  ;;  %1433 = vmatprep.mubr.msk.bf16.mxu0 %vm1675_vm1, %v1674_v18 }
 0x218   :  { %1443 = vmatprep.subr.bf16.mxu0 %v1674_v18 }
 0x219   :  { %v190_v0 = vpop.permute.xlu1 %189 }
 0x21a   :  { %1416 = vmatmul.mubr.msk.bf16.vlgmr.msra.gmra.mrb[12].mxu1 %vm248_vm2, %v1307_v63  ;;  %v1310_v3 = vcombine.low %v190_v0, %v190_v0  ;;  %v1311_v11 = vcombine.high %v190_v0, %v190_v0 }
 0x21b   :  { %1426 = vmatpush3.bf16.xpose.msra.mxu1 %v498_v2  ;;  %1427 = vmatprep.mubr.msk.bf16.mxu1 %vm1675_vm1, %v1674_v18 }
 0x21c   :  { %1437 = vmatprep.subr.bf16.mxu1 %v1674_v18 }
 0x21e   :  { %1434 = vmatmul.mubr.msk.bf16.vlgmr.msra.gmra.mrb[8].mxu0 %vm248_vm2, %v1310_v3 }
 0x21f   :  { %1444 = vmatpush3.bf16.msra.mxu0 %v740_v4  ;;  %1445 = vmatprep.mubr.msk.bf16.mxu0 %vm1675_vm1, %v1674_v18 }
 0x220   :  { %1455 = vmatprep.subr.bf16.mxu0 %v1674_v18 }
 0x222   :  { %1428 = vmatmul.mubr.msk.bf16.vlgmr.msra.gmra.mrb[16].mxu1 %vm248_vm2, %v1309_v6 }
 0x223   :  { %1438 = vmatpush3.bf16.xpose.msra.mxu1 %v596_v7  ;;  %1439 = vmatprep.mubr.msk.bf16.mxu1 %vm1675_vm1, %v1674_v18 }
 0x224   :  { %1449 = vmatprep.subr.bf16.mxu1 %v1674_v18 }
 0x22a   :  { %1440 = vmatmul.mubr.msk.bf16.vlgmr.msra.gmra.mrb[20].mxu1 %vm248_vm2, %v1311_v11 }
 0x22b   :  { %1450 = vmatpush3.bf16.msra.mxu1 %v786_v12  ;;  %1451 = vmatprep.mubr.msk.bf16.mxu1 %vm1675_vm1, %v1674_v18 }
 0x22c   :  { %1461 = vmatprep.subr.bf16.mxu1 %v1674_v18 }
 0x274   :  { %v289_v13 = vpop.f32.mrb[0].mxu1 }
 0x275   :  { %v1399_v14 = vpop.f32.mrb[1].mxu1  ;;  %v639_v15 = vsel %vm638_vm4, %v289_v13, -inf }
 0x276   :  { %v292_v16 = vpop.f32.mrb[2].mxu1  ;;  %640 = vmax.xlane.f32.xlu0 %v639_v15 }
 0x277   :  { %v1400_v17 = vpop.f32.mrb[3].mxu1 }
 0x27c   :  { %v338_v19 = vpop.f32.mrb[4].mxu1 }
 0x27d   :  { %v1405_v20 = vpop.f32.mrb[5].mxu1  ;;  %v642_v21 = vsel %vm638_vm4, %v338_v19, -inf }
 0x27e   :  { %v341_v22 = vpop.f32.mrb[6].mxu1  ;;  %643 = vmax.xlane.f32.xlu1 %v642_v21 }
 0x27f   :  { %v1406_v23 = vpop.f32.mrb[7].mxu1 }
 0x2e5   :  { %v387_v24 = vpop.f32.mrb[8].mxu1 }
 0x2e6   :  { %v1411_v25 = vpop.f32.mrb[9].mxu1  ;;  %v645_v26 = vsel %vm638_vm4, %v387_v24, -inf }
 0x2e7   :  { %646 = vmax.xlane.f32.xlu0 %v645_v26  ;;  %v390_v27 = vpop.f32.mrb[10].mxu1 }
 0x2e8   :  { %v1412_v28 = vpop.f32.mrb[11].mxu1 }
 0x2e9   :  { %v485_v29 = vpop.f32.mrb[4].mxu0 }
 0x2ea   :  { %v1423_v30 = vpop.f32.mrb[5].mxu0  ;;  %v651_v32 = vsel %vm638_vm4, %v485_v29, -inf }
 0x2eb   :  { %652 = vmax.xlane.f32.xlu1 %v651_v32  ;;  %v488_v33 = vpop.f32.mrb[6].mxu0 }
 0x2ec   :  { %v1424_v34 = vpop.f32.mrb[7].mxu0 }
 0x2ed   :  { %v436_v35 = vpop.f32.mrb[12].mxu1 }
 0x2ee   :  { %v1417_v36 = vpop.f32.mrb[13].mxu1  ;;  %v648_v37 = vsel %vm638_vm4, %v436_v35, -inf }
 0x2ef   :  { %649 = vmax.xlane.f32.xlu0 %v648_v37  ;;  %v439_v38 = vpop.f32.mrb[14].mxu1 }
 0x2f0   :  { %v1418_v39 = vpop.f32.mrb[15].mxu1 }
 0x2f1   :  { %v583_v40 = vpop.f32.mrb[8].mxu0 }
 0x2f2   :  { %v1435_v41 = vpop.f32.mrb[9].mxu0  ;;  %v657_v42 = vsel %vm638_vm4, %v583_v40, -inf }
 0x2f3   :  { %658 = vmax.xlane.f32.xlu1 %v657_v42  ;;  %v586_v43 = vpop.f32.mrb[10].mxu0 }
 0x2f4   :  { %v1436_v44 = vpop.f32.mrb[11].mxu0 }
 0x2f5   :  { %v534_v45 = vpop.f32.mrb[16].mxu1 }
 0x2f6   :  { %v1429_v46 = vpop.f32.mrb[17].mxu1  ;;  %v654_v47 = vsel %vm638_vm4, %v534_v45, -inf }
 0x2f7   :  { %655 = vmax.xlane.f32.xlu0 %v654_v47  ;;  %v537_v48 = vpop.f32.mrb[18].mxu1 }
 0x2f8   :  { %v1430_v49 = vpop.f32.mrb[19].mxu1 }
 0x2fd   :  { %v632_v50 = vpop.f32.mrb[20].mxu1 }
 0x2fe   :  { %v1441_v51 = vpop.f32.mrb[21].mxu1  ;;  %v660_v52 = vsel %vm638_vm4, %v632_v50, -inf }
 0x2ff   :  { %661 = vmax.xlane.f32.xlu0 %v660_v52  ;;  %v635_v53 = vpop.f32.mrb[22].mxu1 }
 0x300   :  { %v1442_v54 = vpop.f32.mrb[23].mxu1 }
 0x303   :  { %v641_v58 = vpop.xlane.xlu0 %640 }
 0x304   :  { %223 = vrot.lane.b32.xlu1 %v1796_v31, %s1677_s19  ;;  %v663_v59 = vsub.f32 %v289_v13, %v641_v58 }
 0x306   :  { %v671_v60 = vmul.f32 1.442695, %v663_v59 }
 0x30b   :  { %v644_v55 = vpop.xlane.xlu1 %643 }
 0x30c   :  { %v664_v56 = vsub.f32 %v338_v19, %v644_v55 }
 0x30e   :  { %v673_v57 = vmul.f32 1.442695, %v664_v56 }
 0x310   :  { %1536 = vpow2.f32 %v673_v57 }
 0x311   :  { %1538 = vpow2.f32 %v671_v60 }
 0x31a   :  { %v1537_v61 = vpop.eup %1536 }
 0x31b   :  { %v690_v62 = vsel %vm638_vm4, %v1537_v61, 0.0  ;;  %v1871_v63 = vpop.eup %1538 }
 0x31c   :  { %691 = vadd.xlane.f32.xlu0 %v690_v62  ;;  %v687_v0 = vsel %vm638_vm4, %v1871_v63, 0.0 }
 0x328   :  { %688 = vadd.xlane.f32.xlu1 %v687_v0 }
 0x374   :  { %v647_v1 = vpop.xlane.xlu0 %646 }
 0x375   :  { %v665_v2 = vsub.f32 %v387_v24, %v647_v1 }
 0x377   :  { %v675_v3 = vmul.f32 1.442695, %v665_v2 }
 0x378   :  { %v653_v4 = vpop.xlane.xlu1 %652 }
 0x379   :  { %1540 = vpow2.f32 %v675_v3  ;;  %v667_v5 = vsub.f32 %v485_v29, %v653_v4 }
 0x37b   :  { %v679_v6 = vmul.f32 1.442695, %v667_v5 }
 0x37c   :  { %v650_v7 = vpop.xlane.xlu0 %649 }
 0x37d   :  { %1542 = vpow2.f32 %v679_v6  ;;  %v666_v8 = vsub.f32 %v436_v35, %v650_v7 }
 0x37f   :  { %v677_v11 = vmul.f32 1.442695, %v666_v8 }
 0x380   :  { %v659_v12 = vpop.xlane.xlu1 %658 }
 0x381   :  { %1544 = vpow2.f32 %v677_v11  ;;  %v669_v13 = vsub.f32 %v583_v40, %v659_v12 }
 0x383   :  { %v1541_v14 = vpop.eup %1540  ;;  %v683_v15 = vmul.f32 1.442695, %v669_v13 }
 0x384   :  { %v656_v16 = vpop.xlane.xlu0 %655  ;;  %v693_v17 = vsel %vm638_vm4, %v1541_v14, 0.0  ;;  %v224_v36 = vpop.permute.xlu1 %223 }
 0x385   :  { %1546 = vpow2.f32 %v683_v15  ;;  %v668_v19 = vsub.f32 %v534_v45, %v656_v16  ;;  %694 = vadd.xlane.f32.xlu1 %v693_v17  ;;  %v1315_v38 = vcombine.high %v224_v36, %v224_v36  ;;  %v1314_v44 = vcombine.low %v224_v36, %v224_v36  ;;  %v1533_v36 = vld [vmem:[#allocation8 + $0x8] sm:$0xff]  }
 0x387   :  { %v1876_v20 = vpop.eup %1542  ;;  %v681_v21 = vmul.f32 1.442695, %v668_v19  ;;  %v878_v42 = vsel %vm738_vm3, %v1315_v38, 0  ;;  %v832_v46 = vsel %vm738_vm3, %v1314_v44, 0 }
 0x388   :  { %v699_v22 = vsel %vm638_vm4, %v1876_v20, 0.0 }
 0x389   :  { %1548 = vpow2.f32 %v681_v21  ;;  %700 = vadd.xlane.f32.xlu1 %v699_v22 }
 0x38b   :  { %v1545_v23 = vpop.eup %1544 }
 0x38c   :  { %v662_v24 = vpop.xlane.xlu0 %661  ;;  %v696_v25 = vsel %vm638_vm4, %v1545_v23, 0.0 }
 0x38d   :  { %v670_v26 = vsub.f32 %v632_v50, %v662_v24  ;;  %697 = vadd.xlane.f32.xlu0 %v696_v25 }
 0x38f   :  { %v1881_v27 = vpop.eup %1546  ;;  %v685_v28 = vmul.f32 1.442695, %v670_v26 }
 0x390   :  { %v705_v29 = vsel %vm638_vm4, %v1881_v27, 0.0 }
 0x391   :  { %1550 = vpow2.f32 %v685_v28  ;;  %706 = vadd.xlane.f32.xlu1 %v705_v29 }
 0x393   :  { %v1549_v30 = vpop.eup %1548 }
 0x394   :  { %v702_v32 = vsel %vm638_vm4, %v1549_v30, 0.0 }
 0x395   :  { %703 = vadd.xlane.f32.xlu0 %v702_v32 }
 0x39b   :  { %v1886_v33 = vpop.eup %1550 }
 0x39c   :  { %v708_v34 = vsel %vm638_vm4, %v1886_v33, 0.0 }
 0x39d   :  { %709 = vadd.xlane.f32.xlu0 %v708_v34 }
 0x3a2   :  { %227 = vrot.lane.b32.xlu1 %v1796_v31, %s1676_s2 }
 0x3a9   :  { %v692_v35 = vpop.xlane.xlu0 %691 }
 0x3aa   :  { %1552 = vrcp.f32 %v692_v35 }
 0x3b3   :  { %225 = vrot.lane.b32.xlu0 %v1796_v31, %s1678_s20 }
 0x3b4   :  { %v1553_v37 = vpop.eup %1552 }
 0x3b5   :  { %v720_v39 = vmul.f32 %v1553_v37, %v1537_v61  ;;  %v689_v40 = vpop.xlane.xlu1 %688 }
 0x3b6   :  { %1554 = vrcp.f32 %v689_v40  ;;  %v1535_v40 = vld [vmem:[#allocation8 + $0x18] sm:$0xff]  }
 0x3b7   :  { %v728_v41 = vpack.c.bf16 %v720_v39, %v720_v39  ;;  %v1534_v39 = vld [vmem:[#allocation8 + $0x10] sm:$0xff]  }
 0x3b9   :  { %1452 = vmatmul.mubr.msk.bf16.vlgmr.msra.gmra.mrb[24].mxu1 %vm638_vm4, %v728_v41 }
 0x3ba   :  { %1462 = vmatpush3.bf16.msra.mxu1 %v878_v42  ;;  %1463 = vmatprep.mubr.msk.bf16.mxu1 %vm1675_vm1, %v1674_v18 }
 0x3bb   :  { %1473 = vmatprep.subr.bf16.mxu1 %v1674_v18 }
 0x3c0   :  { %v1555_v43 = vpop.eup %1554 }
 0x3c1   :  { %v719_v31 = vmul.f32 %v1555_v43, %v1871_v63 }
 0x3c3   :  { %v727_v45 = vpack.c.bf16 %v719_v31, %v719_v31 }
 0x3c5   :  { %1446 = vmatmul.mubr.msk.bf16.vlgmr.msra.gmra.mrb[12].mxu0 %vm638_vm4, %v727_v45 }
 0x3c6   :  { %1456 = vmatpush3.bf16.msra.mxu0 %v832_v46  ;;  %1457 = vmatprep.mubr.msk.bf16.mxu0 %vm1675_vm1, %v1674_v18 }
 0x3c7   :  { %1467 = vmatprep.subr.bf16.mxu0 %v1674_v18 }
 0x412   :  { %v695_v47 = vpop.xlane.xlu1 %694 }
 0x413   :  { %1556 = vrcp.f32 %v695_v47 }
 0x416   :  { %v701_v51 = vpop.xlane.xlu1 %700 }
 0x41a   :  { %v698_v48 = vpop.xlane.xlu0 %697 }
 0x41b   :  { %1558 = vrcp.f32 %v698_v48 }
 0x41c   :  { %1560 = vrcp.f32 %v701_v51 }
 0x41d   :  { %v1557_v49 = vpop.eup %1556 }
 0x41e   :  { %v721_v50 = vmul.f32 %v1557_v49, %v1541_v14  ;;  %v707_v56 = vpop.xlane.xlu1 %706 }
 0x420   :  { %v729_v52 = vpack.c.bf16 %v721_v50, %v721_v50 }
 0x422   :  { %1458 = vmatmul.mubr.msk.bf16.vlgmr.msra.gmra.mrb[16].mxu0 %vm638_vm4, %v729_v52  ;;  %v704_v53 = vpop.xlane.xlu0 %703  ;;  %v228_v61 = vpop.permute.xlu1 %227 }
 0x423   :  { %1562 = vrcp.f32 %v704_v53  ;;  %1469 = vmatprep.mubr.msk.bf16.mxu0 %vm1675_vm1, %v1674_v18  ;;  %v1318_v3 = vcombine.low %v228_v61, %v228_v61  ;;  %v1319_v4 = vcombine.high %v228_v61, %v228_v61 }
 0x424   :  { %1564 = vrcp.f32 %v707_v56 }
 0x425   :  { %v1559_v54 = vpop.eup %1558  ;;  %v1016_v13 = vsel %vm738_vm3, %v1318_v3, 0  ;;  %v1062_v14 = vsel %vm738_vm3, %v1319_v4, 0 }
 0x426   :  { %v722_v55 = vmul.f32 %v1559_v54, %v1545_v23  ;;  %v1561_v59 = vpop.eup %1560 }
 0x427   :  { %v723_v63 = vmul.f32 %v1561_v59, %v1876_v20 }
 0x428   :  { %v730_v57 = vpack.c.bf16 %v722_v55, %v722_v55 }
 0x429   :  { %v731_v7 = vpack.c.bf16 %v723_v63, %v723_v63 }
 0x42a   :  { %1464 = vmatmul.mubr.msk.bf16.vlgmr.msra.gmra.mrb[28].mxu1 %vm638_vm4, %v730_v57  ;;  %v710_v58 = vpop.xlane.xlu0 %709 }
 0x42b   :  { %1566 = vrcp.f32 %v710_v58  ;;  %1475 = vmatprep.mubr.msk.bf16.mxu1 %vm1675_vm1, %v1674_v18 }
 0x42d   :  { %v1563_v60 = vpop.eup %1562 }
 0x42e   :  { %v226_v62 = vpop.permute.xlu0 %225  ;;  %v724_v0 = vmul.f32 %v1563_v60, %v1549_v30  ;;  %v1565_v11 = vpop.eup %1564 }
 0x42f   :  { %v1316_v1 = vcombine.low %v226_v62, %v226_v62  ;;  %v1317_v2 = vcombine.high %v226_v62, %v226_v62  ;;  %v725_v15 = vmul.f32 %v1565_v11, %v1881_v27 }
 0x430   :  { %v732_v8 = vpack.c.bf16 %v724_v0, %v724_v0  ;;  %v1344_v0 = vld [vmem:[%s1973_s4] ss:$0 sm:$0xff] }
 0x431   :  { %v924_v5 = vsel %vm738_vm3, %v1316_v1, 0  ;;  %v970_v6 = vsel %vm738_vm3, %v1317_v2, 0  ;;  %v733_v17 = vpack.c.bf16 %v725_v15, %v725_v15 }
 0x432   :  { %1468 = vmatpush3.bf16.msra.mxu0 %v924_v5  ;;  %1474 = vmatpush3.bf16.msra.mxu1 %v970_v6 }
 0x433   :  { %1479 = vmatprep.subr.bf16.mxu0 %v1674_v18  ;;  %1485 = vmatprep.subr.bf16.mxu1 %v1674_v18 }
 0x435   :  { %v1567_v12 = vpop.eup %1566  ;;  %1470 = vmatmul.mubr.msk.bf16.vlgmr.msra.gmra.mrb[20].mxu0 %vm638_vm4, %v731_v7  ;;  %1476 = vmatmul.mubr.msk.bf16.vlgmr.msra.gmra.mrb[32].mxu1 %vm638_vm4, %v732_v8 }
 0x436   :  { %1480 = vmatpush3.bf16.msra.mxu0 %v1016_v13  ;;  %1486 = vmatpush3.bf16.msra.mxu1 %v1062_v14  ;;  %v726_v16 = vmul.f32 %v1567_v12, %v1886_v33  ;;  %v1532_v33 = vld [vmem:[#allocation8] sm:$0xff]  }
 0x437   :  { %1481 = vmatprep.mubr.msk.bf16.mxu0 %vm1675_vm1, %v1674_v18  ;;  %1487 = vmatprep.mubr.msk.bf16.mxu1 %vm1675_vm1, %v1674_v18 }
 0x438   :  { %1491 = vmatprep.subr.bf16.mxu0 %v1674_v18  ;;  %v734_v19 = vpack.c.bf16 %v726_v16, %v726_v16 }
 0x43d   :  { %1482 = vmatmul.mubr.msk.bf16.vlgmr.msra.gmra.mrb[24].mxu0 %vm638_vm4, %v733_v17  ;;  %1488 = vmatmul.mubr.msk.bf16.vlgmr.msra.gmra.mrb[36].mxu1 %vm638_vm4, %v734_v19 }
 0x43e   :  { %1499 = vmatprep.mubr.msk.bf16.mxu0 %vm1675_vm1, %v1674_v18  ;;  %1492 = vmatpush3.bf16.msra.mxu0 %v1532_v33  ;;  %v1350_v33 = vld [vmem:[%s1974_s5] ss:$0 sm:$0xff]  ;;  %s1638_s5 = scalar_lea.vmem %s1283_s30, 256 }
 0x43f   :  { %1493 = vmatprep.subr.bf16.mxu0 %v1674_v18  ;;  %p1639_p10 = scmp.ne.s32.totalorder %s1283_s30, %s1638_s5  ;;  %p1644_p12 = scmp.lt.s32.totalorder %s1638_s5, %s1638_s5 }
 0x441   :  { %p1645_p13 = por %p1644_p12, %p1643_p11 }
 0x442   :  { %1494 = vmatpush3.bf16.msra.mxu0 %v1533_v36 }
 0x443   :  { %1495 = vmatprep.subr.bf16.mxu0 %v1674_v18  ;;  %p1646_p0 = pnand %p1645_p13, %p1639_p10 }
 0x446   :  { %1496 = vmatpush3.bf16.msra.mxu0 %v1534_v39 }
 0x447   :  { %1497 = vmatprep.subr.bf16.mxu0 %v1674_v18 }
 0x44a   :  { %1498 = vmatpush3.bf16.msra.mxu0 %v1535_v40 }
 0x48c   :  { %v822_v20 = vpop.f32.mrb[24].mxu1 }
 0x48d   :  { %1105 = vst.msk [vmem:[#allocation2 + $0x8] sm:$0xff] %vm248_vm2, %v822_v20  ;;  %v1453_v21 = vpop.f32.mrb[25].mxu1 }
 0x48e   :  { %v825_v22 = vpop.f32.mrb[26].mxu1 }
 0x48f   :  { %v1454_v23 = vpop.f32.mrb[27].mxu1 }
 0x498   :  { %v776_v24 = vpop.f32.mrb[12].mxu0 }
 0x499   :  { %1104 = vst.msk [vmem:[#allocation2] sm:$0xff] %vm248_vm2, %v776_v24  ;;  %v1447_v25 = vpop.f32.mrb[13].mxu0 }
 0x49a   :  { %v779_v26 = vpop.f32.mrb[14].mxu0 }
 0x49b   :  { %v1448_v27 = vpop.f32.mrb[15].mxu0 }
 0x4f5   :  { %v868_v28 = vpop.f32.mrb[16].mxu0 }
 0x4f6   :  { %1108 = vrot.lane.b32.xlu1 %v868_v28, %s1679_s21  ;;  %v1459_v29 = vpop.f32.mrb[17].mxu0 }
 0x4f7   :  { %v871_v30 = vpop.f32.mrb[18].mxu0 }
 0x4f8   :  { %v1460_v32 = vpop.f32.mrb[19].mxu0 }
 0x4fd   :  { %v914_v34 = vpop.f32.mrb[28].mxu1 }
 0x4fe   :  { %1110 = vrot.lane.b32.xlu0 %v914_v34, %s1679_s21  ;;  %v1465_v35 = vpop.f32.mrb[29].mxu1 }
 0x4ff   :  { %v917_v37 = vpop.f32.mrb[30].mxu1 }
 0x500   :  { %v1466_v38 = vpop.f32.mrb[31].mxu1  ;;  %v1351_v37 = vld [vmem:[%s1975_s6] ss:$0 sm:$0xff] }
 0x508   :  { %v960_v41 = vpop.f32.mrb[20].mxu0  ;;  %v1006_v42 = vpop.f32.mrb[32].mxu1 }
 0x509   :  { %1121 = vrot.lane.b32.xlu0 %v1006_v42, %s1680_s22  ;;  %v1477_v43 = vpop.f32.mrb[33].mxu1  ;;  %1119 = vrot.lane.b32.xlu1 %v960_v41, %s1680_s22  ;;  %v1471_v44 = vpop.f32.mrb[21].mxu0 }
 0x50a   :  { %v963_v31 = vpop.f32.mrb[22].mxu0  ;;  %v1009_v45 = vpop.f32.mrb[34].mxu1 }
 0x50b   :  { %v1472_v46 = vpop.f32.mrb[23].mxu0  ;;  %v1478_v47 = vpop.f32.mrb[35].mxu1 }
 0x510   :  { %v1052_v48 = vpop.f32.mrb[24].mxu0  ;;  %v1098_v49 = vpop.f32.mrb[36].mxu1 }
 0x511   :  { %1132 = vrot.lane.b32.xlu0 %v1098_v49, %s1681_s23  ;;  %v1489_v50 = vpop.f32.mrb[37].mxu1  ;;  %1130 = vrot.lane.b32.xlu1 %v1052_v48, %s1681_s23  ;;  %v1483_v51 = vpop.f32.mrb[25].mxu0 }
 0x512   :  { %v1055_v18 = vpop.f32.mrb[26].mxu0  ;;  %v1101_v52 = vpop.f32.mrb[38].mxu1 }
 0x513   :  { %v1484_v53 = vpop.f32.mrb[27].mxu0  ;;  %v1490_v54 = vpop.f32.mrb[39].mxu1 }
 0x568   :  { %v1109_v55 = vpop.permute.xlu1 %1108 }
 0x569   :  { %1115 = vst.msk [vmem:[#allocation2] sm:$0xff] %vm1114_vm5, %v1109_v55 }
 0x570   :  { %v1111_v56 = vpop.permute.xlu0 %1110 }
 0x571   :  { %1116 = vst.msk [vmem:[#allocation2 + $0x8] sm:$0xff] %vm1114_vm5, %v1111_v56 }
 0x57b   :  { %v1120_v57 = vpop.permute.xlu1 %1119  ;;  %v1122_v58 = vpop.permute.xlu0 %1121 }
 0x57c   :  { %1126 = vst.msk [vmem:[#allocation2] sm:$0xff] %vm1125_vm6, %v1120_v57  ;;  %1127 = vst.msk [vmem:[#allocation2 + $0x8] sm:$0xff] %vm1125_vm6, %v1122_v58 }
 0x583   :  { %v1131_v59 = vpop.permute.xlu1 %1130  ;;  %v1133_v60 = vpop.permute.xlu0 %1132 }
 0x584   :  { %1137 = vst.msk [vmem:[#allocation2] sm:$0xff] %vm1136_vm7, %v1131_v59  ;;  %1138 = vst.msk [vmem:[#allocation2 + $0x8] sm:$0xff] %vm1136_vm7, %v1133_v60 }
 0x58b   :  { %v1139_v61 = vld [vmem:[#allocation2] sm:$0xff]  ;;  %v1140_v62 = vld [vmem:[#allocation2 + $0x8] sm:$0xff] }
 0x58c   :  { %v1141_v63 = vpack.c.bf16 %v1140_v62, %v1139_v61 }
 0x58e   :  { %1500 = vmatmul.mubr.msk.bf16.vlgmr.msra.gmra.mrb[28].mxu0 %vm132_vm0, %v1141_v63 }
 0x661   :  { %v1218_v1 = vpop.f32.mrb[28].mxu0 }
 0x662   :  { %v1219_v2 = vadd.f32 %v1344_v0, %v1218_v1  ;;  %v1501_v3 = vpop.f32.mrb[29].mxu0 }
 0x663   :  { %v1221_v4 = vpop.f32.mrb[30].mxu0 }
 0x664   :  { %v1225_v5 = vadd.f32 %v1219_v2, %v1774_v9  ;;  %v1222_v6 = vadd.f32 %v1344_v0, %v1221_v4  ;;  %v1502_v7 = vpop.f32.mrb[31].mxu0 }
 0x666   :  { %v1226_v8 = vadd.f32 %v1222_v6, %v1776_v10  ;;  %v1227_v11 = vsel %vm132_vm0, %v1225_v5, 0.0  ;;  %v1233_v14 = vmul.f32 %v1225_v5, %v1225_v5 }
 0x667   :  { %1228 = vadd.xlane.f32.xlu1 %v1227_v11 }
 0x668   :  { %v1230_v12 = vsel %vm132_vm0, %v1226_v8, 0.0  ;;  %v1234_v13 = vmul.f32 %v1226_v8, %v1226_v8  ;;  %v1235_v16 = vsel %vm132_vm0, %v1233_v14, 0.0 }
 0x669   :  { %1231 = vadd.xlane.f32.xlu0 %v1230_v12 }
 0x66a   :  { %v1238_v15 = vsel %vm132_vm0, %v1234_v13, 0.0 }
 0x66b   :  { %1239 = vadd.xlane.f32.xlu1 %v1238_v15 }
 0x66d   :  { %1236 = vadd.xlane.f32.xlu0 %v1235_v16 }
 0x6f4   :  { %v1229_v17 = vpop.xlane.xlu1 %1228 }
 0x6f5   :  { %v1241_v19 = vmul.f32 0.015625, %v1229_v17 }
 0x6f6   :  { %v1232_v9 = vpop.xlane.xlu0 %1231 }
 0x6f7   :  { %v1242_v20 = vmul.f32 0.015625, %v1232_v9  ;;  %v1245_v24 = vmul.f32 %v1241_v19, %v1241_v19  ;;  %v1249_v34 = vsub.f32 %v1225_v5, %v1241_v19 }
 0x6f8   :  { %v1240_v21 = vpop.xlane.xlu1 %1239 }
 0x6f9   :  { %v1246_v10 = vmul.f32 %v1242_v20, %v1242_v20  ;;  %v1244_v22 = vmul.f32 0.015625, %v1240_v21  ;;  %v1250_v30 = vsub.f32 %v1226_v8, %v1242_v20 }
 0x6fa   :  { %v1237_v23 = vpop.xlane.xlu0 %1236 }
 0x6fb   :  { %v1248_v25 = vsub.f32 %v1244_v22, %v1246_v10  ;;  %v1243_v26 = vmul.f32 0.015625, %v1237_v23 }
 0x6fd   :  { %v1252_v27 = vadd.f32 1e-05, %v1248_v25  ;;  %v1247_v28 = vsub.f32 %v1243_v26, %v1245_v24 }
 0x6ff   :  { %1568 = vrsqrt.f32 %v1252_v27  ;;  %v1251_v29 = vadd.f32 1e-05, %v1247_v28 }
 0x701   :  { %1570 = vrsqrt.f32 %v1251_v29 }
 0x709   :  { %v1569_v32 = vpop.eup %1568 }
 0x70a   :  { %v1256_v35 = vmul.f32 %v1569_v32, %v1250_v30 }
 0x70b   :  { %v1571_v36 = vpop.eup %1570 }
 0x70c   :  { %v1255_v38 = vmul.f32 %v1571_v36, %v1249_v34  ;;  %v1265_v39 = vmul.f32 %v1350_v33, %v1256_v35 }
 0x70e   :  { %v1264_v40 = vmul.f32 %v1350_v33, %v1255_v38  ;;  %v1274_v41 = vadd.f32 %v1351_v37, %v1265_v39 }
 0x710   :  { %v1273_v42 = vadd.f32 %v1351_v37, %v1264_v40  ;;  %1276 = vst.msk [vmem:[#allocation9 + $0x8] sm:$0xff] %vm132_vm0, %v1274_v41 }
 0x712   :  { %1275 = vst.msk [vmem:[#allocation9] sm:$0xff] %vm132_vm0, %v1273_v42 }
 0x713   :  { %1649 = shalt.err (!%p1646_p0)
}
 0x714   :  { %s1650_s9 = scalar_lea.hbm %s1976_s7, 256 }
 0x715   :  { %p1651_p1 = scmp.ne.s32.totalorder %s1976_s7, %s1650_s9  ;;  %p1654_p2 = scmp.lt.u32.totalorder %s1650_s9, %s1976_s7 }
 0x717   :  { %p1656_p3 = pnand %p1654_p2, %p1651_p1 }
 0x719   :  { %1659 = shalt.err (!%p1656_p3)
}
 0x71a   :  { %1288 = dma.vmem_to_hbm [thread:$0]  %s1283_s30, 256, %s1976_s7, [#allocation5], %s1668_s13, %s1668_s13, %s1669_s14  }
 0x71b   :  { %1664 = dma.done.wait [#allocation5], 256  }
 0x71c   :  { %1665 = vsyncadd [#allocation5], 4294967040 }
 0x71d   :  { %1292 = vsyncpa [#allocation4], 1 }
 0x71e   :  { %1293 = vsyncpa [#allocation7], 1 }
 0x71f   :  { %1294 = vsyncpa [#allocation5], 1 }

</bundles_post_ra>
